<compile_context>
chip_gen: v5e
topology: v5e:2x2
jax: 0.10.0
libtpu: 0.0.40
codegen_flags: <defaults>
</compile_context>

<pallas_src>
import jax
import jax.numpy as jnp
from jax.experimental import pallas as pl
from jax.experimental.pallas import tpu as pltpu

FC_1_IN = 8
FC_1_OUT = 16
FC_2_IN = 16
FC_2_OUT = 4
BATCH_DIM = 2

PACK = 32                      # batch rows folded into one lane-dense row
D_IN_P = PACK * FC_1_IN        # 256 lanes  (2 full vreg lane groups)
D_HID_P = PACK * FC_1_OUT      # 512 lanes
D_OUT_P = PACK * FC_2_OUT      # 128 lanes  (exactly one lane group)

SMALL_MAX = 1024               # up to this many batch rows: one gridless block
MAX_TILE_ROWS = 1024           # packed rows per grid step (= 32768 batch rows)


# ---------------------------------------------------------------------------
# Kernels
# ---------------------------------------------------------------------------
def mlp_small_kernel(x_ref, w1b_ref, w2b_ref, o_ref):
    # w1b_ref = [[W1], [b1]]  -> (FC_1_IN + 1, FC_1_OUT)
    # w2b_ref = [[W2], [b2]]  -> (FC_2_IN + 1, FC_2_OUT)
    x = x_ref[...]
    h = jnp.dot(x, w1b_ref[:FC_1_IN, :], preferred_element_type=jnp.float32)
    h = jnp.maximum(h + w1b_ref[FC_1_IN:FC_1_IN + 1, :], 0.0)
    y = jnp.dot(h, w2b_ref[:FC_2_IN, :], preferred_element_type=jnp.float32)
    y = jnp.maximum(y + w2b_ref[FC_2_IN:FC_2_IN + 1, :], 0.0)
    o_ref[...] = y.astype(o_ref.dtype)


def mlp_packed_kernel(x_ref, w1p_ref, b1p_ref, w2p_ref, b2p_ref, o_ref):
    # Lane-dense layout: each row of x_ref holds PACK=32 batch rows.
    # w1p/w2p are block-diagonal kron(I_32, W); b1p/b2p are the biases tiled 32x.
    x = x_ref[...]                                              # (T, 256)
    h = jnp.dot(x, w1p_ref[...], preferred_element_type=jnp.float32)
    h = jnp.maximum(h + b1p_ref[...], 0.0)                      # (T, 512)
    y = jnp.dot(h, w2p_ref[...], preferred_element_type=jnp.float32)
    y = jnp.maximum(y + b2p_ref[...], 0.0)                      # (T, 128)
    o_ref[...] = y.astype(o_ref.dtype)
    # TODO(synk): optional micro-opt — fold the biases into the matmul via a
    # ones column on the packed x slab; skipped since the kernel is HBM-bound
    # and the two broadcast-adds are free VPU filler.


# ---------------------------------------------------------------------------
# One-time parameter packing
# ---------------------------------------------------------------------------
def pack_params(w1, b1, w2, b2):
    """One-time packing for both kernel paths (not per-call work)."""
    # Small/gridless path: fold each bias in as an extra row ([W; b]).
    w1b = jnp.concatenate([w1, b1.reshape(1, FC_1_OUT)], axis=0)
    w2b = jnp.concatenate([w2, b2.reshape(1, FC_2_OUT)], axis=0)
    # Lane-dense path: block-diagonal weights + tiled biases so x can be viewed
    # (free reshape) as (B/32, 256) and the output as (B/32, 128).
    eye = jnp.eye(PACK, dtype=w1.dtype)
    w1p = jnp.kron(eye, w1)                        # (256, 512)
    w2p = jnp.kron(eye, w2)                        # (512, 128)
    b1p = jnp.tile(b1, PACK).reshape(1, D_HID_P)   # (1, 512)
    b2p = jnp.tile(b2, PACK).reshape(1, D_OUT_P)   # (1, 128)
    return dict(w1b=w1b, w2b=w2b, w1p=w1p, b1p=b1p, w2p=w2p, b2p=b2p)


# ---------------------------------------------------------------------------
# Wrappers
# ---------------------------------------------------------------------------
def _mlp_small(x, w1b, w2b):
    # Tiny/mid problem: single invocation, no grid, no pipelining machinery.
    # (Below ~64 rows one could skip Pallas entirely and let XLA fuse this,
    #  but the Pallas path is kept so the spec-shape run exercises the kernel.)
    B = x.shape[0]
    return pl.pallas_call(
        mlp_small_kernel,
        out_shape=jax.ShapeDtypeStruct((B, FC_2_OUT), jnp.float32),
        in_specs=[
            pl.BlockSpec(memory_space=pltpu.MemorySpace.VMEM),
            pl.BlockSpec(memory_space=pltpu.MemorySpace.VMEM),
            pl.BlockSpec(memory_space=pltpu.MemorySpace.VMEM),
        ],
        out_specs=pl.BlockSpec(memory_space=pltpu.MemorySpace.VMEM),
    )(x, w1b, w2b)


def _choose_tile_rows(n_rows):
    # Aim for >= ~4 grid steps so both v7x TensorCores get work, cap the tile
    # so the double-buffered VMEM footprint stays small, and keep the sublane
    # dim a multiple of 8 (the (8,128) block constraint).
    target = pl.cdiv(n_rows, 4)
    tile = min(MAX_TILE_ROWS, max(8, target))
    if tile < n_rows:
        tile = max(8, (tile // 8) * 8)
    else:
        tile = n_rows
    return tile


def _mlp_packed(x, params):
    B = x.shape[0]
    assert B % PACK == 0
    n_rows = B // PACK
    xp = x.reshape(n_rows, D_IN_P)        # free view of contiguous rows
    tile_rows = _choose_tile_rows(n_rows)
    n_tiles = pl.cdiv(n_rows, tile_rows)  # last block may be partial: Pallas
                                          # pads the edge read and masks the
                                          # edge store, so no wrapper pad/slice.
    out = pl.pallas_call(
        mlp_packed_kernel,
        out_shape=jax.ShapeDtypeStruct((n_rows, D_OUT_P), jnp.float32),
        grid=(n_tiles,),
        in_specs=[
            pl.BlockSpec((tile_rows, D_IN_P), lambda i: (i, 0)),
            pl.BlockSpec((D_IN_P, D_HID_P), lambda i: (0, 0)),   # VMEM-resident
            pl.BlockSpec((1, D_HID_P), lambda i: (0, 0)),
            pl.BlockSpec((D_HID_P, D_OUT_P), lambda i: (0, 0)),
            pl.BlockSpec((1, D_OUT_P), lambda i: (0, 0)),
        ],
        out_specs=pl.BlockSpec((tile_rows, D_OUT_P), lambda i: (i, 0)),
        compiler_params=pltpu.CompilerParams(
            dimension_semantics=("parallel",),
            # Double-buffered footprint at tile_rows=1024 is ~8-10 MiB;
            # 32 MiB leaves headroom and fits every generation (v7x: 64 MiB).
            vmem_limit_bytes=32 * 1024 * 1024,
        ),
    )(xp, params["w1p"], params["b1p"], params["w2p"], params["b2p"])
    return out.reshape(B, FC_2_OUT)       # free view back to (B, 4)


def mlp_forward(x, params):
    B = x.shape[0]
    if B <= SMALL_MAX:
        return _mlp_small(x, params["w1b"], params["w2b"])
    main = (B // PACK) * PACK
    x_main = x if main == B else x[:main]
    y_main = _mlp_packed(x_main, params)
    if main == B:
        return y_main
    # <32-row tail: tiny gridless call instead of padding the whole array.
    y_tail = _mlp_small(x[main:], params["w1b"], params["w2b"])
    return jnp.concatenate([y_main, y_tail], axis=0)


# ---------------------------------------------------------------------------
# Init / reference / test
# ---------------------------------------------------------------------------
def init_params(key):
    # Deterministic init mimicking nn.Linear's uniform(-1/sqrt(fan_in), 1/sqrt(fan_in))
    k1, k2, k3, k4 = jax.random.split(key, 4)
    bound1 = 1.0 / (FC_1_IN ** 0.5)
    bound2 = 1.0 / (FC_2_IN ** 0.5)
    w1 = jax.random.uniform(k1, (FC_1_IN, FC_1_OUT), jnp.float32, -bound1, bound1)
    b1 = jax.random.uniform(k2, (FC_1_OUT,), jnp.float32, -bound1, bound1)
    w2 = jax.random.uniform(k3, (FC_2_IN, FC_2_OUT), jnp.float32, -bound2, bound2)
    b2 = jax.random.uniform(k4, (FC_2_OUT,), jnp.float32, -bound2, bound2)
    return w1, b1, w2, b2


def _reference(x, w1, b1, w2, b2):
    return jnp.maximum(jnp.maximum(x @ w1 + b1, 0.0) @ w2 + b2, 0.0)


if __name__ == "__main__":
    key = jax.random.PRNGKey(0)
    kx, kp, kb1, kb2 = jax.random.split(key, 4)
    w1, b1, w2, b2 = init_params(kp)
    params = pack_params(w1, b1, w2, b2)

    # Spec shape: B = 2 -> gridless single-block Pallas path.
    x = jax.random.normal(kx, (BATCH_DIM, FC_1_IN), dtype=jnp.float32)
    out = jax.block_until_ready(mlp_forward(x, params))
    ref = _reference(x, w1, b1, w2, b2)
    assert out.shape == (BATCH_DIM, FC_2_OUT)
    assert jnp.allclose(out, ref, atol=1e-5, rtol=1e-5)

    # Lane-dense gridded path with a partial edge block:
    # n_rows = 100 packed rows, tile = 24 -> 5 steps, last step store-masked.
    B_big = 100 * PACK
    x_big = jax.random.normal(kb1, (B_big, FC_1_IN), dtype=jnp.float32)
    out_big = jax.block_until_ready(mlp_forward(x_big, params))
    assert out_big.shape == (B_big, FC_2_OUT)
    assert jnp.allclose(out_big, _reference(x_big, w1, b1, w2, b2),
                        atol=1e-4, rtol=1e-4)

    # Batch not a multiple of 32: head through the packed path, 7-row tail
    # through the tiny gridless kernel.
    B_odd = 100 * PACK + 7
    x_odd = jax.random.normal(kb2, (B_odd, FC_1_IN), dtype=jnp.float32)
    out_odd = jax.block_until_ready(mlp_forward(x_odd, params))
    assert out_odd.shape == (B_odd, FC_2_OUT)
    assert jnp.allclose(out_odd, _reference(x_odd, w1, b1, w2, b2),
                        atol=1e-4, rtol=1e-4)

    print("KERNEL_OK")
</pallas_src>

<mosaic_0001>
module attributes {stable_mosaic.version = 11 : i64} {
  func.func @mlp_small_kernel(%arg0: memref<2x8xf32, #tpu.memory_space<vmem>>, %arg1: memref<9x16xf32, #tpu.memory_space<vmem>>, %arg2: memref<17x4xf32, #tpu.memory_space<vmem>>, %arg3: memref<2x4xf32, #tpu.memory_space<vmem>>) attributes {dimension_semantics = [], scalar_prefetch = 0 : i64, scratch_operands = 0 : i64, tpu.core_type = #tpu.core_type<tc>} {
    %c0 = arith.constant 0 : index
    %c0_0 = arith.constant 0 : index
    %0 = vector.load %arg0[%c0, %c0_0] : memref<2x8xf32, #tpu.memory_space<vmem>>, vector<2x8xf32>
    %c0_1 = arith.constant 0 : index
    %c0_2 = arith.constant 0 : index
    %1 = vector.load %arg1[%c0_1, %c0_2] : memref<9x16xf32, #tpu.memory_space<vmem>>, vector<8x16xf32>
    %cst = arith.constant dense<0.000000e+00> : vector<2x16xf32>
    %2 = tpu.matmul %0, %1, %cst {dimension_numbers = #tpu.dot_dimension_numbers<[1], [0], [0], [1], [0, 0, 1, 1], [], []>} : vector<2x8xf32>, vector<8x16xf32>, vector<2x16xf32> -> vector<2x16xf32>
    %c8 = arith.constant 8 : index
    %c0_3 = arith.constant 0 : index
    %3 = vector.load %arg1[%c8, %c0_3] : memref<9x16xf32, #tpu.memory_space<vmem>>, vector<1x16xf32>
    %4 = vector.broadcast %3 : vector<1x16xf32> to vector<2x16xf32>
    %5 = arith.addf %2, %4 : vector<2x16xf32>
    %cst_4 = arith.constant 0.000000e+00 : f32
    %6 = vector.broadcast %cst_4 : f32 to vector<2x16xf32>
    %7 = arith.maximumf %5, %6 : vector<2x16xf32>
    %c0_5 = arith.constant 0 : index
    %c0_6 = arith.constant 0 : index
    %8 = vector.load %arg2[%c0_5, %c0_6] : memref<17x4xf32, #tpu.memory_space<vmem>>, vector<16x4xf32>
    %cst_7 = arith.constant dense<0.000000e+00> : vector<2x4xf32>
    %9 = tpu.matmul %7, %8, %cst_7 {dimension_numbers = #tpu.dot_dimension_numbers<[1], [0], [0], [1], [0, 0, 1, 1], [], []>} : vector<2x16xf32>, vector<16x4xf32>, vector<2x4xf32> -> vector<2x4xf32>
    %c16 = arith.constant 16 : index
    %c0_8 = arith.constant 0 : index
    %10 = vector.load %arg2[%c16, %c0_8] : memref<17x4xf32, #tpu.memory_space<vmem>>, vector<1x4xf32>
    %11 = vector.broadcast %10 : vector<1x4xf32> to vector<2x4xf32>
    %12 = arith.addf %9, %11 : vector<2x4xf32>
    %cst_9 = arith.constant 0.000000e+00 : f32
    %13 = vector.broadcast %cst_9 : f32 to vector<2x4xf32>
    %14 = arith.maximumf %12, %13 : vector<2x4xf32>
    %c0_10 = arith.constant 0 : index
    %c0_11 = arith.constant 0 : index
    %15 = vector.load %arg3[%c0_10, %c0_11] : memref<2x4xf32, #tpu.memory_space<vmem>>, vector<2x4xf32>
    tpu.vector_store %arg3[%c0_10, %c0_11], %14 {strides = array<i32>} : memref<2x4xf32, #tpu.memory_space<vmem>>, vector<2x4xf32>,
    return
  }
}

</mosaic_0001>

<bundles_post_ra>
// kernel: tpu_custom_call.1
= control target key start
LH: loop header
LB: loop body
LE: loop exit
PB: predicated region body
PF: predicated region fallthrough
CT: control target
= control target key end

     0   :  { %vm19_vm0 = vcmask 64512   ;;  %s164_s0 = inlined_call_operand.vmem [shape: f32[2,8], index: 0, kind: input, shape index: {}]   ;;  %s165_s1 = inlined_call_operand.vmem [shape: f32[9,16], index: 1, kind: input, shape index: {}]   ;;  %s166_s2 = inlined_call_operand.vmem [shape: f32[17,4], index: 2, kind: input, shape index: {}]   ;;  %s167_s3 = inlined_call_operand.hbm [shape: f32[2,4], index: 3, kind: output, shape index: {}]  }
   0x1   :  { %v16_v0 = vld [vmem:[%s165_s1] sm:$0xff] }
   0x2   :  { %v15_v1 = vld [vmem:[%s164_s0] sm:$0x3]  ;;  %38 = vmatpush.msra.mxu0 %v16_v0 }
   0x3   :  { %8 = vsyncpa [#allocation3], 0  ;;  %91 = vmatmul.msk.f32.vlgmr.msra.gmra.mxu0 %vm19_vm0, %v15_v1  ;;  %v45_v2 = vld [vmem:[%s166_s2 + $0x8] sm:$0xff]  ;;  %v44_v3 = vld [vmem:[%s166_s2] sm:$0xff]  ;;  %vm48_vm1 = vcmask 130048   ;;  %s122_s23 = smov [#allocation2]  }
   0x4   :  { %66 = vmatpush.msra.mxu1 %v45_v2  ;;  %v94_v4 = vld [vmem:[%s165_s1 + $0x8] ss:$0 sm:$0xff]  ;;  %v95_v8 = vld [vmem:[%s166_s2 + $0x10] ss:$0 sm:$0xff]  ;;  %s80_s24 = sshll.u32 %s122_s23, 4  ;;  %s82_s27 = sshll.u32 %s167_s3, 4  ;;  %s81_s24 = int_to_ptr.vmem [resolvable:$true] %s80_s24  ;;  %s83_s27 = int_to_ptr.hbm [resolvable:$true] %s82_s27 }
   0x5   :  { %vm73_vm2 = vcmask 25600  }
   0x6   :  { %67 = vmatpush.msra.mxu1 %v44_v3 }
  0x80   :  { %v40_v5 = vpop.f32.mrf.mxu0 }
  0x81   :  { %v41_v6 = vadd.f32 %v94_v4, %v40_v5 }
  0x83   :  { %v43_v7 = vmax.f32 %v41_v6, 0.0 }
  0x85   :  { %92 = vmatmul.msk.f32.vlgmr.msra.gmra.mxu1 %vm48_vm1, %v43_v7 }
 0x102   :  { %v69_v9 = vpop.f32.mrf.mxu1 }
 0x103   :  { %v70_v10 = vadd.f32 %v95_v8, %v69_v9 }
 0x105   :  { %v72_v11 = vmax.f32 %v70_v10, 0.0 }
 0x107   :  { %74 = vst.msk [vmem:[#allocation2] sm:$0x3] %vm73_vm2, %v72_v11 }
 0x108   :  { %85 = dma.vmem_to_hbm [thread:$0]  %s81_s24, 32, %s83_s27, [#allocation3]  }
 0x109   :  { %120 = dma.done.wait [#allocation3], 32  }
 0x10a   :  { %121 = vsyncadd [#allocation3], 4294967264 }
 0x10b   :  { %90 = vsyncpa [#allocation3], 1 }

</bundles_post_ra>
